<compile_context>
chip_gen: v6e
topology: v6e:2x2x1
jax: 0.10.0
libtpu: 0.0.40
codegen_flags: <defaults>
</compile_context>

<pallas_src>
import jax
import jax.numpy as jnp
from jax import lax
from jax.experimental import pallas as pl
from jax.experimental.pallas import tpu as pltpu


def _round_up(x, m):
    return ((x + m - 1) // m) * m


def _linear_prelu_kernel(x_ref, w_ref, alpha_ref, o_ref, acc_ref):
    # x_ref:     (tm, tk) VMEM   activation tile
    # w_ref:     (tn, tk) VMEM   weight tile, PyTorch (out_ft, in_ft) layout
    # alpha_ref: (1, 1)   SMEM   PReLU slope
    # o_ref:     (tm, tn) VMEM   output tile (resident across the K grid axis)
    # acc_ref:   (tm, tn) VMEM   f32 accumulator scratch
    k = pl.program_id(2)

    @pl.when(k == 0)
    def _():
        acc_ref[...] = jnp.zeros_like(acc_ref)

    # Contract the last (K) dim of both operands == x @ W.T, no transpose needed.
    acc_ref[...] += lax.dot_general(
        x_ref[...],
        w_ref[...],
        dimension_numbers=(((1,), (1,)), ((), ())),
        preferred_element_type=jnp.float32,
    )

    # Fused PReLU + cast/store only on the final K step.
    @pl.when(k == pl.num_programs(2) - 1)
    def _():
        e = acc_ref[...]
        a = alpha_ref[0, 0]
        o_ref[...] = jnp.where(e > 0, e, a * e).astype(o_ref.dtype)


def linear_layer_forward(x, w, alpha, *, max_tm=256, max_tn=256, max_tk=512):
    """Forward pass of LinearLayer (linear, no bias, then PReLU).

    x:     (batch, in_ft)  float32
    w:     (out_ft, in_ft) float32   -- PyTorch nn.Linear weight convention (NOT transposed)
    alpha: ()              float32   -- PReLU single learnable slope
    returns (batch, out_ft) float32
    """
    batch, in_ft = x.shape
    out_ft, in_ft_w = w.shape
    assert in_ft == in_ft_w, "weight/in_ft mismatch"

    # ---- tile selection: sublane(8)/lane(128) aligned, capped for v7x VMEM ----
    tm = min(_round_up(batch, 8), max_tm)
    tn = min(_round_up(out_ft, 128), max_tn)
    tk = min(_round_up(in_ft, 128), max_tk)

    m_pad = _round_up(batch, tm)
    n_pad = _round_up(out_ft, tn)
    k_pad = _round_up(in_ft, tk)

    # Zero-pad to exact tile multiples (zeros are neutral for the dot; padded
    # output rows/cols are sliced away at the end). No-op for aligned shapes.
    if (m_pad, k_pad) != (batch, in_ft):
        x = jnp.pad(x, ((0, m_pad - batch), (0, k_pad - in_ft)))
    if (n_pad, k_pad) != (out_ft, in_ft):
        w = jnp.pad(w, ((0, n_pad - out_ft), (0, k_pad - in_ft)))

    grid = (m_pad // tm, n_pad // tn, k_pad // tk)
    alpha2d = jnp.reshape(alpha, (1, 1)).astype(jnp.float32)

    cost = pl.CostEstimate(
        flops=2 * m_pad * n_pad * k_pad,
        transcendentals=0,
        bytes_accessed=4 * (m_pad * k_pad + n_pad * k_pad + m_pad * n_pad),
    )

    out_padded = pl.pallas_call(
        _linear_prelu_kernel,
        out_shape=jax.ShapeDtypeStruct((m_pad, n_pad), x.dtype),
        grid_spec=pltpu.PrefetchScalarGridSpec(
            num_scalar_prefetch=0,
            grid=grid,
            in_specs=[
                pl.BlockSpec((tm, tk), lambda i, j, k: (i, k)),   # x tile
                pl.BlockSpec((tn, tk), lambda i, j, k: (j, k)),   # W tile (out_ft, in_ft)
                pl.BlockSpec(memory_space=pltpu.SMEM),            # alpha scalar
            ],
            out_specs=pl.BlockSpec((tm, tn), lambda i, j, k: (i, j)),
            scratch_shapes=[pltpu.VMEM((tm, tn), jnp.float32)],
        ),
        compiler_params=pltpu.CompilerParams(
            dimension_semantics=("parallel", "parallel", "arbitrary"),
            vmem_limit_bytes=32 * 1024 * 1024,  # safe on v5e/v6e/v7x, ample for these tiles
        ),
        cost_estimate=cost,
    )(x, w, alpha2d)

    return out_padded[:batch, :out_ft]


def xavier_uniform(key, out_ft, in_ft):
    # torch.nn.init.xavier_uniform_: U(-a, a), a = sqrt(6 / (fan_in + fan_out))
    bound = (6.0 / (in_ft + out_ft)) ** 0.5
    return jax.random.uniform(
        key, (out_ft, in_ft), dtype=jnp.float32, minval=-bound, maxval=bound
    )


def _reference(x, w, alpha):
    e = x @ w.T
    return jnp.where(e > 0, e, alpha * e)


if __name__ == "__main__":
    key = jax.random.PRNGKey(0)
    k1, k2, k3, k4 = jax.random.split(key, 4)
    alpha = jnp.float32(0.25)  # nn.PReLU() default init
    # NOTE: drop_prob=0.0 and isBias=False in the module, so forward is exactly linear+PReLU.

    # Case 1: toy shape straight from the module spec (exercises the padding path).
    x1 = jax.random.normal(k1, (8, 32), dtype=jnp.float32)
    w1 = xavier_uniform(k2, 16, 32)                # (out_ft, in_ft)
    out1 = linear_layer_forward(x1, w1, alpha)
    jax.block_until_ready(out1)
    assert out1.shape == (8, 16)
    assert jnp.allclose(out1, _reference(x1, w1, alpha), atol=1e-5, rtol=1e-5)

    # Case 2: lane-dense, tile-aligned shape exercising the 3-D grid with K accumulation
    # (M, N, K) = (256, 256, 1024) -> grid (1, 1, 2), tiles (256, 256, 512).
    x2 = jax.random.normal(k3, (256, 1024), dtype=jnp.float32)
    w2 = xavier_uniform(k4, 256, 1024)
    out2 = linear_layer_forward(x2, w2, alpha)
    jax.block_until_ready(out2)
    assert out2.shape == (256, 256)
    # Slightly looser tolerance: tiled K accumulation order differs from XLA's dot.
    assert jnp.allclose(out2, _reference(x2, w2, alpha), atol=2e-3, rtol=2e-3)

    print("KERNEL_OK")
</pallas_src>

<mosaic_0001>
module attributes {stable_mosaic.version = 11 : i64} {
  func.func @_linear_prelu_kernel(%arg0: i32, %arg1: i32, %arg2: i32, %arg3: memref<8x128xf32, #tpu.memory_space<vmem>>, %arg4: memref<128x128xf32, #tpu.memory_space<vmem>>, %arg5: memref<1x1xf32, #tpu.memory_space<smem>>, %arg6: memref<8x128xf32, #tpu.memory_space<vmem>>, %arg7: memref<8x128xf32, #tpu.memory_space<vmem>>) attributes {dimension_semantics = [#tpu.dimension_semantics<parallel>, #tpu.dimension_semantics<parallel>, #tpu.dimension_semantics<arbitrary>], iteration_bounds = array<i64: 1, 1, 1>, scalar_prefetch = 0 : i64, scratch_operands = 1 : i64, tpu.core_type = #tpu.core_type<tc>, window_params = [{transform_indices = @transform_0, window_bounds = array<i64: 8, 128>}, {transform_indices = @transform_1, window_bounds = array<i64: 128, 128>}, {transform_indices = @transform_2, window_bounds = array<i64: 1, 1>}, {transform_indices = @transform_3, window_bounds = array<i64: 8, 128>}]} {
    %c0_i32 = arith.constant 0 : i32
    %0 = arith.cmpi eq, %arg2, %c0_i32 : i32
    %1 = arith.extui %0 : i1 to i32
    %c0_i32_0 = arith.constant 0 : i32
    %2 = arith.cmpi ne, %1, %c0_i32_0 : i32
    scf.if %2 {
      %cst_10 = arith.constant 0.000000e+00 : f32
      %12 = vector.broadcast %cst_10 : f32 to vector<8x128xf32>
      %c0_11 = arith.constant 0 : index
      %c0_12 = arith.constant 0 : index
      %13 = vector.load %arg7[%c0_11, %c0_12] : memref<8x128xf32, #tpu.memory_space<vmem>>, vector<8x128xf32>
      tpu.vector_store %arg7[%c0_11, %c0_12], %12 {strides = array<i32>} : memref<8x128xf32, #tpu.memory_space<vmem>>, vector<8x128xf32>,
    } else {
    }
    %c0 = arith.constant 0 : index
    %c0_1 = arith.constant 0 : index
    %3 = vector.load %arg7[%c0, %c0_1] : memref<8x128xf32, #tpu.memory_space<vmem>>, vector<8x128xf32>
    %c0_2 = arith.constant 0 : index
    %c0_3 = arith.constant 0 : index
    %4 = vector.load %arg3[%c0_2, %c0_3] : memref<8x128xf32, #tpu.memory_space<vmem>>, vector<8x128xf32>
    %c0_4 = arith.constant 0 : index
    %c0_5 = arith.constant 0 : index
    %5 = vector.load %arg4[%c0_4, %c0_5] : memref<128x128xf32, #tpu.memory_space<vmem>>, vector<128x128xf32>
    %cst = arith.constant dense<0.000000e+00> : vector<8x128xf32>
    %6 = tpu.matmul %4, %5, %cst {dimension_numbers = #tpu.dot_dimension_numbers<[1], [1], [0], [0], [0, 0, 1, 0], [], []>} : vector<8x128xf32>, vector<128x128xf32>, vector<8x128xf32> -> vector<8x128xf32>
    %7 = arith.addf %3, %6 : vector<8x128xf32>
    %c0_6 = arith.constant 0 : index
    %c0_7 = arith.constant 0 : index
    %8 = vector.load %arg7[%c0_6, %c0_7] : memref<8x128xf32, #tpu.memory_space<vmem>>, vector<8x128xf32>
    tpu.vector_store %arg7[%c0_6, %c0_7], %7 {strides = array<i32>} : memref<8x128xf32, #tpu.memory_space<vmem>>, vector<8x128xf32>,
    %c0_i32_8 = arith.constant 0 : i32
    %9 = arith.cmpi eq, %arg2, %c0_i32_8 : i32
    %10 = arith.extui %9 : i1 to i32
    %c0_i32_9 = arith.constant 0 : i32
    %11 = arith.cmpi ne, %10, %c0_i32_9 : i32
    scf.if %11 {
      %c0_10 = arith.constant 0 : index
      %c0_11 = arith.constant 0 : index
      %12 = vector.load %arg7[%c0_10, %c0_11] : memref<8x128xf32, #tpu.memory_space<vmem>>, vector<8x128xf32>
      %c0_12 = arith.constant 0 : index
      %c0_13 = arith.constant 0 : index
      %13 = memref.load %arg5[%c0_12, %c0_13] : memref<1x1xf32, #tpu.memory_space<smem>>
      %cst_14 = arith.constant 0.000000e+00 : f32
      %14 = vector.broadcast %cst_14 : f32 to vector<8x128xf32>
      %15 = arith.cmpf ogt, %12, %14 : vector<8x128xf32>
      %16 = vector.broadcast %13 : f32 to vector<8x128xf32>
      %17 = arith.mulf %16, %12 : vector<8x128xf32>
      %18 = arith.select %15, %12, %17 : vector<8x128xi1>, vector<8x128xf32>
      %c0_15 = arith.constant 0 : index
      %c0_16 = arith.constant 0 : index
      %19 = vector.load %arg6[%c0_15, %c0_16] : memref<8x128xf32, #tpu.memory_space<vmem>>, vector<8x128xf32>
      tpu.vector_store %arg6[%c0_15, %c0_16], %18 {strides = array<i32>} : memref<8x128xf32, #tpu.memory_space<vmem>>, vector<8x128xf32>,
    } else {
    }
    return
  }
  func.func @transform_0(%arg0: i32, %arg1: i32, %arg2: i32) -> (i32, i32) {
    %c0_i32 = arith.constant 0 : i32
    return %arg0, %arg2 : i32, i32
  }
  func.func @transform_1(%arg0: i32, %arg1: i32, %arg2: i32) -> (i32, i32) {
    %c0_i32 = arith.constant 0 : i32
    return %arg1, %arg2 : i32, i32
  }
  func.func @transform_2(%arg0: i32, %arg1: i32, %arg2: i32) -> (i32, i32) {
    %c0_i32 = arith.constant 0 : i32
    %c0_i32_0 = arith.constant 0 : i32
    %c0_i32_1 = arith.constant 0 : i32
    return %c0_i32, %c0_i32_0 : i32, i32
  }
  func.func @transform_3(%arg0: i32, %arg1: i32, %arg2: i32) -> (i32, i32) {
    %c0_i32 = arith.constant 0 : i32
    return %arg0, %arg1 : i32, i32
  }
}

</mosaic_0001>

<bundles_post_ra>
// kernel: tpu_custom_call.1
= control target key start
LH: loop header
LB: loop body
LE: loop exit
PB: predicated region body
PF: predicated region fallthrough
CT: control target
= control target key end

     0   :  { %9 = vsyncpa [#allocation5], 0  ;;  %s327_s0 = inlined_call_operand.hbm [shape: f32[8,128], index: 0, kind: input, shape index: {}]   ;;  %s328_s1 = inlined_call_operand.hbm [shape: f32[128,128], index: 1, kind: input, shape index: {}]   ;;  %s329_s2 = inlined_call_operand.<no memory space> [shape: f32[1,1], index: 2, kind: input, shape index: {}]   ;;  %s330_s3 = inlined_call_operand.hbm [shape: f32[8,128], index: 3, kind: output, shape index: {}]  }
   0x1   :  { %10 = vsyncpa [#allocation8], 0 }
   0x2   :  { %11 = vsyncpa [#allocation6], 0  ;;  %s288_s12 = smov [#allocation4]   ;;  %s289_s14 = smov [#allocation7]  }
   0x3   :  { %s18_s13 = sshll.u32 %s288_s12, 4  ;;  %s27_s15 = sshll.u32 %s289_s14, 4  ;;  %s19_s13 = int_to_ptr.vmem [resolvable:$true] %s18_s13  ;;  %s28_s15 = int_to_ptr.vmem [resolvable:$true] %s27_s15 }
   0x4   :  { %s230_s16 = scalar_lea.vmem %s19_s13, 128  ;;  %p235_p1 = scmp.lt.s32.totalorder %s19_s13, %s19_s13 }
   0x5   :  { %p231_p0 = scmp.ne.s32.totalorder %s19_s13, %s230_s16  ;;  %p236_p2 = scmp.lt.s32.totalorder %s230_s16, %s230_s16 }
   0x7   :  { %p237_p3 = por %p236_p2, %p235_p1 }
   0x9   :  { %p238_p4 = pnand %p237_p3, %p231_p0 }
   0xb   :  { %241 = shalt.err (!%p238_p4)
}
   0xc   :  { %21 = dma.hbm_to_vmem [thread:$0]  %s327_s0, 128, %s19_s13, [#allocation5]  }
   0xd   :  { %s250_s19 = scalar_lea.vmem %s28_s15, 2048  ;;  %p255_p6 = scmp.lt.s32.totalorder %s28_s15, %s28_s15 }
   0xe   :  { %p251_p5 = scmp.ne.s32.totalorder %s28_s15, %s250_s19  ;;  %p256_p7 = scmp.lt.s32.totalorder %s250_s19, %s250_s19 }
  0x10   :  { %p257_p8 = por %p256_p7, %p255_p6 }
  0x12   :  { %p258_p9 = pnand %p257_p8, %p251_p5 }
  0x14   :  { %261 = shalt.err (!%p258_p9)
}
  0x15   :  { %s290_s20 = smov 128   ;;  %s291_s21 = smov 8  }
  0x16   :  { %33 = dma.hbm_to_vmem [thread:$0]  %s328_s1, 2048, %s28_s15, [#allocation8], %s290_s20, %s290_s20, %s291_s21  }
  0x17   :  { %282 = dma.done.wait [#allocation5], 128  }
  0x18   :  { %283 = vsyncadd [#allocation5], 4294967168 }
  0x19   :  { %284 = dma.done.wait [#allocation8], 2048  }
  0x1a   :  { %285 = vsyncadd [#allocation8], 4294965248  ;;  %v292_v0 = vmov 0.0   ;;  %vm293_vm0 = vmmov 0   ;;  %v64_v1 = vld [vmem:[#allocation7 + $0x78] sm:$0xff]  ;;  %v63_v2 = vld [vmem:[#allocation7 + $0x70] sm:$0xff]  ;;  %v143_v18 = vstv %s329_s2 }
  0x1b   :  { %180 = vmatprep.subr.mxu0 %v292_v0  ;;  %212 = vmatprep.mubr.msk.f32.mxu0 %vm293_vm0, %v292_v0  ;;  %v62_v3 = vld [vmem:[#allocation7 + $0x68] sm:$0xff]  ;;  %v61_v4 = vld [vmem:[#allocation7 + $0x60] sm:$0xff]  ;;  %v60_v5 = vld [vmem:[#allocation7 + $0x58] sm:$0xff]  ;;  %s294_s24 = smov [#allocation9]  }
  0x1c   :  { %181 = vmatpush3.xpose.msra.mxu0 %v64_v1  ;;  %v59_v6 = vld [vmem:[#allocation7 + $0x50] sm:$0xff]  ;;  %v58_v7 = vld [vmem:[#allocation7 + $0x48] sm:$0xff]  ;;  %v57_v8 = vld [vmem:[#allocation7 + $0x40] sm:$0xff]  ;;  %s153_s25 = sshll.u32 %s294_s24, 4  ;;  %s154_s25 = int_to_ptr.vmem [resolvable:$true] %s153_s25 }
  0x1d   :  { %182 = vmatprep.subr.mxu0 %v292_v0  ;;  %v56_v9 = vld [vmem:[#allocation7 + $0x38] sm:$0xff]  ;;  %v55_v10 = vld [vmem:[#allocation7 + $0x30] sm:$0xff]  ;;  %v54_v11 = vld [vmem:[#allocation7 + $0x28] sm:$0xff]  ;;  %s262_s26 = scalar_lea.vmem %s154_s25, 128  ;;  %p267_p11 = scmp.lt.s32.totalorder %s154_s25, %s154_s25 }
  0x1e   :  { %v53_v12 = vld [vmem:[#allocation7 + $0x20] sm:$0xff]  ;;  %v52_v13 = vld [vmem:[#allocation7 + $0x18] sm:$0xff]  ;;  %v51_v14 = vld [vmem:[#allocation7 + $0x10] sm:$0xff]  ;;  %p263_p10 = scmp.ne.s32.totalorder %s154_s25, %s262_s26  ;;  %p268_p12 = scmp.lt.s32.totalorder %s262_s26, %s262_s26 }
  0x1f   :  { %v50_v15 = vld [vmem:[#allocation7 + $0x8] sm:$0xff]  ;;  %v49_v16 = vld [vmem:[#allocation7] sm:$0xff]  ;;  %v48_v17 = vld [vmem:[#allocation4] sm:$0xff] }
  0x20   :  { %183 = vmatpush3.xpose.msra.mxu0 %v63_v2  ;;  %p269_p13 = por %p268_p12, %p267_p11 }
  0x21   :  { %184 = vmatprep.subr.mxu0 %v292_v0 }
  0x22   :  { %p270_p0 = pnand %p269_p13, %p263_p10 }
  0x24   :  { %185 = vmatpush3.xpose.msra.mxu0 %v62_v3 }
  0x25   :  { %186 = vmatprep.subr.mxu0 %v292_v0 }
  0x28   :  { %187 = vmatpush3.xpose.msra.mxu0 %v61_v4 }
  0x29   :  { %188 = vmatprep.subr.mxu0 %v292_v0 }
  0x2c   :  { %189 = vmatpush3.xpose.msra.mxu0 %v60_v5 }
  0x2d   :  { %190 = vmatprep.subr.mxu0 %v292_v0 }
  0x30   :  { %191 = vmatpush3.xpose.msra.mxu0 %v59_v6 }
  0x31   :  { %192 = vmatprep.subr.mxu0 %v292_v0 }
  0x34   :  { %193 = vmatpush3.xpose.msra.mxu0 %v58_v7 }
  0x35   :  { %194 = vmatprep.subr.mxu0 %v292_v0 }
  0x38   :  { %195 = vmatpush3.xpose.msra.mxu0 %v57_v8 }
  0x39   :  { %196 = vmatprep.subr.mxu0 %v292_v0 }
  0x3c   :  { %197 = vmatpush3.xpose.msra.mxu0 %v56_v9 }
  0x3d   :  { %198 = vmatprep.subr.mxu0 %v292_v0 }
  0x40   :  { %199 = vmatpush3.xpose.msra.mxu0 %v55_v10 }
  0x41   :  { %200 = vmatprep.subr.mxu0 %v292_v0 }
  0x44   :  { %201 = vmatpush3.xpose.msra.mxu0 %v54_v11 }
  0x45   :  { %202 = vmatprep.subr.mxu0 %v292_v0 }
  0x48   :  { %203 = vmatpush3.xpose.msra.mxu0 %v53_v12 }
  0x49   :  { %204 = vmatprep.subr.mxu0 %v292_v0 }
  0x4c   :  { %205 = vmatpush3.xpose.msra.mxu0 %v52_v13 }
  0x4d   :  { %206 = vmatprep.subr.mxu0 %v292_v0 }
  0x50   :  { %207 = vmatpush3.xpose.msra.mxu0 %v51_v14 }
  0x51   :  { %208 = vmatprep.subr.mxu0 %v292_v0 }
  0x54   :  { %209 = vmatpush3.xpose.msra.mxu0 %v50_v15 }
  0x55   :  { %210 = vmatprep.subr.mxu0 %v292_v0 }
  0x58   :  { %211 = vmatpush3.xpose.msra.mxu0 %v49_v16 }
  0x5b   :  { %213 = vmatmul.mubr.f32.vlgmr.msra.gmra.mxu0 %v48_v17 }
 0x11b   :  { %v131_v19 = vpop.f32.mrf.mxu0 }
 0x11c   :  { %vm142_vm1 = vcmp.gt.f32.partialorder %v131_v19, 0.0  ;;  %v144_v20 = vmul.f32 %v143_v18, %v131_v19 }
 0x11d   :  { %v214_v21 = vpop.f32.mrf.mxu0 }
 0x11e   :  { %v145_v22 = vsel %vm142_vm1, %v131_v19, %v144_v20 }
 0x11f   :  { %146 = vst [vmem:[#allocation9] sm:$0xff] %v145_v22 }
 0x120   :  { %273 = shalt.err (!%p270_p0)
}
 0x121   :  { %156 = dma.vmem_to_hbm [thread:$0]  %s154_s25, 128, %s330_s3, [#allocation6]  }
 0x122   :  { %286 = dma.done.wait [#allocation6], 128  }
 0x123   :  { %287 = vsyncadd [#allocation6], 4294967168 }
 0x124   :  { %160 = vsyncpa [#allocation5], 1 }
 0x125   :  { %161 = vsyncpa [#allocation8], 1 }
 0x126   :  { %162 = vsyncpa [#allocation6], 1 }

</bundles_post_ra>
